<compile_context>
chip_gen: v5e
topology: v5e:2x2
jax: 0.10.0
libtpu: 0.0.40
codegen_flags: <defaults>
</compile_context>

<pallas_src>
from functools import partial

import jax
import jax.numpy as jnp
from jax import lax
from jax.experimental import pallas as pl
from jax.experimental.pallas import tpu as pltpu


# ---------------------------------------------------------------------------
# Pallas kernel: TOK tokens per grid step
# ---------------------------------------------------------------------------
def _bert_embeddings_kernel(ids_ref,              # (N,) int32 scalar-prefetch (SMEM)
                            tt_ref,               # (1, TOK, 1) int32 token-type ids
                            pos_ref,              # (TOK, H) position-embedding slab
                            type_ref,             # (T, H) token-type table (VMEM resident)
                            g_ref, b_ref,         # (1, H) LayerNorm gamma / beta
                            w_hbm,                # (V, H) word table, stays in HBM (ANY)
                            o_ref,                # (1, TOK, H) output block
                            wbuf, sems,           # (TOK, H) VMEM staging, (TOK,) DMA sems
                            *, eps, tok, seq_len):
    bi = pl.program_id(0)
    si = pl.program_id(1)
    n0 = bi * seq_len + si * tok          # flat index of first token in this block
    H = o_ref.shape[-1]

    # 1) issue all per-row word-embedding gathers; they stay in flight together.
    @pl.loop(0, tok)
    def _(r):
        row = ids_ref[n0 + r]
        pltpu.make_async_copy(w_hbm.at[pl.ds(row, 1), :],
                              wbuf.at[pl.ds(r, 1), :],
                              sems.at[r]).start()

    # 2) while those DMAs fly: position slab + token-type rows from the
    #    VMEM-resident table (T is tiny, e.g. 2 -> cheap select loop).
    pos_rows = pos_ref[...].astype(jnp.float32)                    # (TOK, H)
    tt = tt_ref[0]                                                 # (TOK, 1) int32
    type_rows = jnp.zeros((tok, H), jnp.float32)
    for t in range(type_ref.shape[0]):
        type_rows = type_rows + (jnp.where(tt == t, 1.0, 0.0)
                                 * type_ref[t].astype(jnp.float32))
    gamma = g_ref[...].astype(jnp.float32)                         # (1, H)
    beta = b_ref[...].astype(jnp.float32)                          # (1, H)

    # 3) wait for the gathered word rows.
    @pl.loop(0, tok)
    def _(r):
        pltpu.make_async_copy(w_hbm.at[pl.ds(0, 1), :],
                              wbuf.at[pl.ds(r, 1), :],
                              sems.at[r]).wait()

    # 4) sum (each term already f32) + LayerNorm; dense (TOK, H) store.
    x = wbuf[...].astype(jnp.float32) + type_rows + pos_rows
    mu = jnp.mean(x, axis=-1, keepdims=True)
    var = jnp.mean((x - mu) ** 2, axis=-1, keepdims=True)
    y = (x - mu) * lax.rsqrt(var + eps)
    y = y * gamma + beta
    # TODO(synk): hidden dropout omitted (identity in eval mode).
    o_ref[0] = y.astype(o_ref.dtype)


# ---------------------------------------------------------------------------
# wrapper
# ---------------------------------------------------------------------------
def bert_embeddings(input_ids, word_emb, pos_emb, type_emb, gamma, beta,
                    *, token_type_ids=None, position_ids=None, eps=1e-12,
                    tok_block=None):
    """BertEmbeddings.forward. input_ids: (B, S) int32 -> (B, S, H)."""
    B, S = input_ids.shape
    V, H = word_emb.shape
    T = type_emb.shape[0]

    if token_type_ids is None:
        token_type_ids = jnp.zeros((B, S), jnp.int32)

    # Token-block size: multiple of 8 that divides S (256 at realistic sizes).
    if tok_block is None:
        tok_block = min(S, 256)
    TOK = tok_block
    assert S % TOK == 0 and TOK % 8 == 0, "tok_block must divide S and be a multiple of 8"
    S_tiles = S // TOK
    N = B * S

    ids_flat = input_ids.reshape(N).astype(jnp.int32)              # SMEM prefetch
    tt3 = token_type_ids.reshape(B, S, 1).astype(jnp.int32)
    g2 = gamma.reshape(1, H)
    b2 = beta.reshape(1, H)

    if position_ids is None:
        # Default absolute positions = arange(S): the position slab for S-tile
        # `s` is just rows [s*TOK, (s+1)*TOK) of the table — no gather, no SMEM
        # array, slab index comes straight from the grid index.
        pos_src = pos_emb                                           # (P, H)
        pos_map = lambda bi, si, ids: (si, 0)
    else:
        # Rare path: pre-gather in the wrapper, keep the same kernel.
        position_ids = jnp.broadcast_to(position_ids.astype(jnp.int32), (B, S))
        pos_src = pos_emb[position_ids.reshape(N)]                  # (N, H)
        pos_map = lambda bi, si, ids: (bi * S_tiles + si, 0)

    kernel = partial(_bert_embeddings_kernel, eps=eps, tok=TOK, seq_len=S)

    out = pl.pallas_call(
        kernel,
        out_shape=jax.ShapeDtypeStruct((B, S, H), word_emb.dtype),
        grid_spec=pltpu.PrefetchScalarGridSpec(
            num_scalar_prefetch=1,
            grid=(B, S_tiles),
            in_specs=[
                # token-type ids for this token block
                pl.BlockSpec((1, TOK, 1), lambda bi, si, ids: (bi, si, 0)),
                # position-embedding slab
                pl.BlockSpec((TOK, H), pos_map),
                # token-type table: whole array resident in VMEM
                pl.BlockSpec((T, H), lambda bi, si, ids: (0, 0)),
                # LayerNorm gamma / beta (constant blocks)
                pl.BlockSpec((1, H), lambda bi, si, ids: (0, 0)),
                pl.BlockSpec((1, H), lambda bi, si, ids: (0, 0)),
                # word-embedding table: never resident, manual per-row gather
                pl.BlockSpec(memory_space=pl.ANY),
            ],
            out_specs=pl.BlockSpec((1, TOK, H), lambda bi, si, ids: (bi, si, 0)),
            scratch_shapes=[
                pltpu.VMEM((TOK, H), word_emb.dtype),   # gathered word rows
                pltpu.SemaphoreType.DMA((TOK,)),        # one sem per row DMA
            ],
        ),
        compiler_params=pltpu.CompilerParams(
            dimension_semantics=("parallel", "parallel")),
    )(ids_flat, tt3, pos_src, type_emb, g2, b2, word_emb)

    return out


# ---------------------------------------------------------------------------
# pure-JAX reference (for correctness check)
# ---------------------------------------------------------------------------
def bert_embeddings_ref(input_ids, word_emb, pos_emb, type_emb, gamma, beta,
                        *, token_type_ids=None, position_ids=None, eps=1e-12):
    B, S = input_ids.shape
    if token_type_ids is None:
        token_type_ids = jnp.zeros((B, S), jnp.int32)
    if position_ids is None:
        position_ids = jnp.arange(S, dtype=jnp.int32)[None, :]
    position_ids = jnp.broadcast_to(position_ids, (B, S))
    e = word_emb[input_ids] + type_emb[token_type_ids] + pos_emb[position_ids]
    mu = jnp.mean(e, axis=-1, keepdims=True)
    var = jnp.mean((e - mu) ** 2, axis=-1, keepdims=True)
    return (e - mu) * lax.rsqrt(var + eps) * gamma + beta


# ---------------------------------------------------------------------------
if __name__ == "__main__":
    # small config consistent with the module
    B, S, H = 2, 16, 128          # H=128 -> lane-dense; TOK=8 -> sublane-dense
    VOCAB, MAX_POS, TYPE_VOCAB = 32, 32, 2
    EPS = 1e-12
    TOK = 8                       # 2 S-tiles per batch row -> exercises both grid axes
    PAD_ID = 0                    # padding_idx: forward is a plain lookup

    key = jax.random.PRNGKey(0)
    kw, kp, kt, kb, ki, ktt = jax.random.split(key, 6)

    word_emb = 0.02 * jax.random.normal(kw, (VOCAB, H), jnp.float32)
    pos_emb = 0.02 * jax.random.normal(kp, (MAX_POS, H), jnp.float32)
    type_emb = 0.02 * jax.random.normal(kt, (TYPE_VOCAB, H), jnp.float32)
    gamma = jnp.ones((H,), jnp.float32)
    beta = 0.01 * jax.random.normal(kb, (H,), jnp.float32)

    input_ids = jax.random.randint(ki, (B, S), 0, VOCAB, dtype=jnp.int32)
    token_type_ids = jax.random.randint(ktt, (B, S), 0, TYPE_VOCAB,
                                        dtype=jnp.int32)
    # position_ids defaults to arange(S) (absolute), as in the torch module.

    out = bert_embeddings(input_ids, word_emb, pos_emb, type_emb, gamma, beta,
                          token_type_ids=token_type_ids, eps=EPS,
                          tok_block=TOK)
    out = jax.block_until_ready(out)

    ref = bert_embeddings_ref(input_ids, word_emb, pos_emb, type_emb,
                              gamma, beta, token_type_ids=token_type_ids,
                              eps=EPS)
    assert out.shape == (B, S, H)
    assert jnp.allclose(out, ref, rtol=1e-5, atol=1e-5), \
        f"max abs err {jnp.max(jnp.abs(out - ref))}"

    print("KERNEL_OK")
</pallas_src>

<mosaic_0001>
module attributes {stable_mosaic.version = 11 : i64} {
  func.func @_bert_embeddings_kernel(%arg0: i32, %arg1: i32, %arg2: memref<32xi32, #tpu.memory_space<smem>>, %arg3: memref<1x8x1xi32, #tpu.memory_space<vmem>>, %arg4: memref<8x128xf32, #tpu.memory_space<vmem>>, %arg5: memref<2x128xf32, #tpu.memory_space<vmem>>, %arg6: memref<1x128xf32, #tpu.memory_space<vmem>>, %arg7: memref<1x128xf32, #tpu.memory_space<vmem>>, %arg8: memref<32x128xf32, #tpu.memory_space<any>>, %arg9: memref<1x8x128xf32, #tpu.memory_space<vmem>>, %arg10: memref<8x128xf32, #tpu.memory_space<vmem>>, %arg11: memref<8x!tpu.dma_semaphore, #tpu.memory_space<semaphore_mem>>) attributes {dimension_semantics = [#tpu.dimension_semantics<parallel>, #tpu.dimension_semantics<parallel>], iteration_bounds = array<i64: 2, 2>, scalar_prefetch = 1 : i64, scratch_operands = 2 : i64, tpu.core_type = #tpu.core_type<tc>, window_params = [{transform_indices = @transform_0, window_bounds = array<i64: 1, 8, 1>}, {transform_indices = @transform_1, window_bounds = array<i64: 8, 128>}, {pipeline_mode = #tpu.pipeline_mode<synchronous>, transform_indices = @transform_2, window_bounds = array<i64: 2, 128>}, {pipeline_mode = #tpu.pipeline_mode<synchronous>, transform_indices = @transform_3, window_bounds = array<i64: 1, 128>}, {pipeline_mode = #tpu.pipeline_mode<synchronous>, transform_indices = @transform_4, window_bounds = array<i64: 1, 128>}, {}, {transform_indices = @transform_6, window_bounds = array<i64: 1, 8, 128>}]} {
    %c16_i32 = arith.constant 16 : i32
    %0 = arith.muli %arg0, %c16_i32 : i32
    %c8_i32 = arith.constant 8 : i32
    %1 = arith.muli %arg1, %c8_i32 : i32
    %2 = arith.addi %0, %1 : i32
    %c0_i32 = arith.constant 0 : i32
    %c8_i32_0 = arith.constant 8 : i32
    %3 = arith.addi %c0_i32, %c8_i32_0 : i32
    %c1_i32 = arith.constant 1 : i32
    scf.for %arg12 = %c0_i32 to %3 step %c1_i32  : i32 {
      %c1_i32_33 = arith.constant 1 : i32
      %63 = arith.muli %arg12, %c1_i32_33 : i32
      %c0_i32_34 = arith.constant 0 : i32
      %64 = arith.addi %c0_i32_34, %63 : i32
      %65 = arith.addi %2, %64 : i32
      %66 = arith.index_cast %65 : i32 to index
      %67 = memref.load %arg2[%66] : memref<32xi32, #tpu.memory_space<smem>>
      %c0_i32_35 = arith.constant 0 : i32
      %68 = tpu.memref_slice %arg8[%67, %c0_i32_35] : memref<32x128xf32, #tpu.memory_space<any>> -> memref<1x128xf32, #tpu.memory_space<any>>
      %c0_i32_36 = arith.constant 0 : i32
      %69 = tpu.memref_slice %arg10[%64, %c0_i32_36] : memref<8x128xf32, #tpu.memory_space<vmem>> -> memref<1x128xf32, #tpu.memory_space<vmem>>
      %70 = tpu.memref_slice %arg11[%64] : memref<8x!tpu.dma_semaphore, #tpu.memory_space<semaphore_mem>> -> memref<1x!tpu.dma_semaphore, #tpu.memory_space<semaphore_mem>>
      %71 = tpu.memref_squeeze %70 : memref<1x!tpu.dma_semaphore, #tpu.memory_space<semaphore_mem>> -> memref<!tpu.dma_semaphore, #tpu.memory_space<semaphore_mem>>
      tpu.enqueue_dma source(%68 : memref<1x128xf32, #tpu.memory_space<any>>) target(%69 : memref<1x128xf32, #tpu.memory_space<vmem>>) target_semaphore(%71 : memref<!tpu.dma_semaphore, #tpu.memory_space<semaphore_mem>>)
    }
    %c8_i32_1 = arith.constant 8 : i32
    %c0 = arith.constant 0 : index
    %c0_2 = arith.constant 0 : index
    %4 = vector.load %arg4[%c0, %c0_2] : memref<8x128xf32, #tpu.memory_space<vmem>>, vector<8x128xf32>
    %c0_3 = arith.constant 0 : index
    %c0_4 = arith.constant 0 : index
    %c0_5 = arith.constant 0 : index
    %5 = vector.load %arg3[%c0_3, %c0_4, %c0_5] : memref<1x8x1xi32, #tpu.memory_space<vmem>>, vector<1x8x1xi32>
    %6 = vector.shape_cast %5 : vector<1x8x1xi32> to vector<8x1xi32>
    %cst = arith.constant 0.000000e+00 : f32
    %7 = vector.broadcast %cst : f32 to vector<8x128xf32>
    %c0_i32_6 = arith.constant 0 : i32
    %8 = vector.broadcast %c0_i32_6 : i32 to vector<8x1xi32>
    %9 = arith.cmpi eq, %6, %8 : vector<8x1xi32>
    %cst_7 = arith.constant 1.000000e+00 : f32
    %cst_8 = arith.constant 0.000000e+00 : f32
    %10 = vector.broadcast %cst_7 : f32 to vector<8x1xf32>
    %11 = vector.broadcast %cst_8 : f32 to vector<8x1xf32>
    %12 = arith.select %9, %10, %11 : vector<8x1xi1>, vector<8x1xf32>
    %c0_9 = arith.constant 0 : index
    %c0_10 = arith.constant 0 : index
    %13 = vector.load %arg5[%c0_9, %c0_10] : memref<2x128xf32, #tpu.memory_space<vmem>>, vector<1x128xf32>
    %14 = vector.shape_cast %13 : vector<1x128xf32> to vector<128xf32>
    %15 = vector.shape_cast %14 : vector<128xf32> to vector<1x128xf32>
    %16 = vector.broadcast %12 : vector<8x1xf32> to vector<8x128xf32>
    %17 = vector.broadcast %15 : vector<1x128xf32> to vector<8x128xf32>
    %18 = arith.mulf %16, %17 : vector<8x128xf32>
    %19 = arith.addf %7, %18 : vector<8x128xf32>
    %c1_i32_11 = arith.constant 1 : i32
    %20 = vector.broadcast %c1_i32_11 : i32 to vector<8x1xi32>
    %21 = arith.cmpi eq, %6, %20 : vector<8x1xi32>
    %cst_12 = arith.constant 1.000000e+00 : f32
    %cst_13 = arith.constant 0.000000e+00 : f32
    %22 = vector.broadcast %cst_12 : f32 to vector<8x1xf32>
    %23 = vector.broadcast %cst_13 : f32 to vector<8x1xf32>
    %24 = arith.select %21, %22, %23 : vector<8x1xi1>, vector<8x1xf32>
    %c1 = arith.constant 1 : index
    %c0_14 = arith.constant 0 : index
    %25 = vector.load %arg5[%c1, %c0_14] : memref<2x128xf32, #tpu.memory_space<vmem>>, vector<1x128xf32>
    %26 = vector.shape_cast %25 : vector<1x128xf32> to vector<128xf32>
    %27 = vector.shape_cast %26 : vector<128xf32> to vector<1x128xf32>
    %28 = vector.broadcast %24 : vector<8x1xf32> to vector<8x128xf32>
    %29 = vector.broadcast %27 : vector<1x128xf32> to vector<8x128xf32>
    %30 = arith.mulf %28, %29 : vector<8x128xf32>
    %31 = arith.addf %19, %30 : vector<8x128xf32>
    %c0_15 = arith.constant 0 : index
    %c0_16 = arith.constant 0 : index
    %32 = vector.load %arg6[%c0_15, %c0_16] : memref<1x128xf32, #tpu.memory_space<vmem>>, vector<1x128xf32>
    %c0_17 = arith.constant 0 : index
    %c0_18 = arith.constant 0 : index
    %33 = vector.load %arg7[%c0_17, %c0_18] : memref<1x128xf32, #tpu.memory_space<vmem>>, vector<1x128xf32>
    %c0_i32_19 = arith.constant 0 : i32
    %c8_i32_20 = arith.constant 8 : i32
    %34 = arith.addi %c0_i32_19, %c8_i32_20 : i32
    %c1_i32_21 = arith.constant 1 : i32
    scf.for %arg12 = %c0_i32_19 to %34 step %c1_i32_21  : i32 {
      %c1_i32_33 = arith.constant 1 : i32
      %63 = arith.muli %arg12, %c1_i32_33 : i32
      %c0_i32_34 = arith.constant 0 : i32
      %64 = arith.addi %c0_i32_34, %63 : i32
      %c0_i32_35 = arith.constant 0 : i32
      %c0_i32_36 = arith.constant 0 : i32
      %65 = tpu.memref_slice %arg8[%c0_i32_35, %c0_i32_36] : memref<32x128xf32, #tpu.memory_space<any>> -> memref<1x128xf32, #tpu.memory_space<any>>
      %c0_i32_37 = arith.constant 0 : i32
      %66 = tpu.memref_slice %arg10[%64, %c0_i32_37] : memref<8x128xf32, #tpu.memory_space<vmem>> -> memref<1x128xf32, #tpu.memory_space<vmem>>
      %67 = tpu.memref_slice %arg11[%64] : memref<8x!tpu.dma_semaphore, #tpu.memory_space<semaphore_mem>> -> memref<1x!tpu.dma_semaphore, #tpu.memory_space<semaphore_mem>>
      %68 = tpu.memref_squeeze %67 : memref<1x!tpu.dma_semaphore, #tpu.memory_space<semaphore_mem>> -> memref<!tpu.dma_semaphore, #tpu.memory_space<semaphore_mem>>
      tpu.wait_dma2 semaphore(%68 : memref<!tpu.dma_semaphore, #tpu.memory_space<semaphore_mem>>) src(%65 : memref<1x128xf32, #tpu.memory_space<any>>) dst(%66 : memref<1x128xf32, #tpu.memory_space<vmem>>)
    }
    %c8_i32_22 = arith.constant 8 : i32
    %c0_23 = arith.constant 0 : index
    %c0_24 = arith.constant 0 : index
    %35 = vector.load %arg10[%c0_23, %c0_24] : memref<8x128xf32, #tpu.memory_space<vmem>>, vector<8x128xf32>
    %36 = arith.addf %35, %31 : vector<8x128xf32>
    %37 = arith.addf %36, %4 : vector<8x128xf32>
    %cst_25 = arith.constant dense<0.000000e+00> : vector<8xf32>
    %38 = vector.multi_reduction <add>, %37, %cst_25 [1] : vector<8x128xf32> to vector<8xf32>
    %39 = vector.shape_cast %38 : vector<8xf32> to vector<8x1xf32>
    %cst_26 = arith.constant 1.280000e+02 : f32
    %40 = vector.broadcast %cst_26 : f32 to vector<8x1xf32>
    %41 = arith.divf %39, %40 : vector<8x1xf32>
    %42 = vector.broadcast %41 : vector<8x1xf32> to vector<8x128xf32>
    %43 = arith.subf %37, %42 : vector<8x128xf32>
    %44 = arith.mulf %43, %43 : vector<8x128xf32>
    %cst_27 = arith.constant dense<0.000000e+00> : vector<8xf32>
    %45 = vector.multi_reduction <add>, %44, %cst_27 [1] : vector<8x128xf32> to vector<8xf32>
    %46 = vector.shape_cast %45 : vector<8xf32> to vector<8x1xf32>
    %cst_28 = arith.constant 1.280000e+02 : f32
    %47 = vector.broadcast %cst_28 : f32 to vector<8x1xf32>
    %48 = arith.divf %46, %47 : vector<8x1xf32>
    %49 = vector.broadcast %41 : vector<8x1xf32> to vector<8x128xf32>
    %50 = arith.subf %37, %49 : vector<8x128xf32>
    %cst_29 = arith.constant 9.99999996E-13 : f32
    %51 = vector.broadcast %cst_29 : f32 to vector<8x1xf32>
    %52 = arith.addf %48, %51 : vector<8x1xf32>
    %53 = math.rsqrt %52 : vector<8x1xf32>
    %54 = vector.broadcast %53 : vector<8x1xf32> to vector<8x128xf32>
    %55 = arith.mulf %50, %54 : vector<8x128xf32>
    %56 = vector.broadcast %32 : vector<1x128xf32> to vector<8x128xf32>
    %57 = arith.mulf %55, %56 : vector<8x128xf32>
    %58 = vector.broadcast %33 : vector<1x128xf32> to vector<8x128xf32>
    %59 = arith.addf %57, %58 : vector<8x128xf32>
    %c0_30 = arith.constant 0 : index
    %c0_31 = arith.constant 0 : index
    %c0_32 = arith.constant 0 : index
    %60 = vector.load %arg9[%c0_30, %c0_31, %c0_32] : memref<1x8x128xf32, #tpu.memory_space<vmem>>, vector<1x8x128xf32>
    %61 = vector.shape_cast %60 : vector<1x8x128xf32> to vector<8x128xf32>
    %62 = vector.shape_cast %59 : vector<8x128xf32> to vector<1x8x128xf32>
    tpu.vector_store %arg9[%c0_30, %c0_31, %c0_32], %62 {strides = array<i32>} : memref<1x8x128xf32, #tpu.memory_space<vmem>>, vector<1x8x128xf32>,
    return
  }
  func.func @transform_0(%arg0: i32, %arg1: i32, %arg2: memref<32xi32, #tpu.memory_space<smem>>) -> (i32, i32, i32) {
    %c0_i32 = arith.constant 0 : i32
    %c0_i32_0 = arith.constant 0 : i32
    return %arg0, %arg1, %c0_i32 : i32, i32, i32
  }
  func.func @transform_1(%arg0: i32, %arg1: i32, %arg2: memref<32xi32, #tpu.memory_space<smem>>) -> (i32, i32) {
    %c0_i32 = arith.constant 0 : i32
    %c0_i32_0 = arith.constant 0 : i32
    return %arg1, %c0_i32 : i32, i32
  }
  func.func @transform_2(%arg0: i32, %arg1: i32, %arg2: memref<32xi32, #tpu.memory_space<smem>>) -> (i32, i32) {
    %c0_i32 = arith.constant 0 : i32
    %c0_i32_0 = arith.constant 0 : i32
    %c0_i32_1 = arith.constant 0 : i32
    return %c0_i32, %c0_i32_0 : i32, i32
  }
  func.func @transform_3(%arg0: i32, %arg1: i32, %arg2: memref<32xi32, #tpu.memory_space<smem>>) -> (i32, i32) {
    %c0_i32 = arith.constant 0 : i32
    %c0_i32_0 = arith.constant 0 : i32
    %c0_i32_1 = arith.constant 0 : i32
    return %c0_i32, %c0_i32_0 : i32, i32
  }
  func.func @transform_4(%arg0: i32, %arg1: i32, %arg2: memref<32xi32, #tpu.memory_space<smem>>) -> (i32, i32) {
    %c0_i32 = arith.constant 0 : i32
    %c0_i32_0 = arith.constant 0 : i32
    %c0_i32_1 = arith.constant 0 : i32
    return %c0_i32, %c0_i32_0 : i32, i32
  }
  func.func @transform_6(%arg0: i32, %arg1: i32, %arg2: memref<32xi32, #tpu.memory_space<smem>>) -> (i32, i32, i32) {
    %c0_i32 = arith.constant 0 : i32
    %c0_i32_0 = arith.constant 0 : i32
    return %arg0, %arg1, %c0_i32 : i32, i32, i32
  }
}

</mosaic_0001>

<bundles_post_ra>
// kernel: tpu_custom_call.1
= control target key start
LH: loop header
LB: loop body
LE: loop exit
PB: predicated region body
PF: predicated region fallthrough
CT: control target
= control target key end

     0   :  { %s833_s27 = smov [#allocation5]   ;;  %s1071_s0 = inlined_call_operand.vmem [shape: s32[32], index: 0, kind: input, shape index: {}]   ;;  %s1072_s1 = inlined_call_operand.vmem [shape: s32[2,16,1], index: 1, kind: input, shape index: {}]   ;;  %s1073_s2 = inlined_call_operand.vmem [shape: f32[32,128], index: 2, kind: input, shape index: {}]   ;;  %s1074_s3 = inlined_call_operand.vmem [shape: f32[2,128], index: 3, kind: input, shape index: {}]   ;;  %s1075_s4 = inlined_call_operand.vmem [shape: f32[1,128], index: 4, kind: input, shape index: {}]   ;;  %s1076_s5 = inlined_call_operand.vmem [shape: f32[1,128], index: 5, kind: input, shape index: {}]   ;;  %s1077_s6 = inlined_call_operand.hbm [shape: f32[32,128], index: 6, kind: input, shape index: {}]   ;;  %s1078_s7 = inlined_call_operand.hbm [shape: f32[2,16,128], index: 7, kind: output, shape index: {}]  }
   0x1   :  { %1086 = sst [smem:[#allocation22_spill]] %s1072_s1  ;;  %s13_s26 = sshll.u32 %s1071_s0, 4  ;;  %s14_s26 = int_to_ptr.vmem [resolvable:$true] %s13_s26 }
   0x2   :  { %16 = dma.vmem_to_smem %s14_s26, 16, %s833_s27, [#allocation4] }
   0x3   :  { %785 = dma.done.wait [#allocation4], 16 }
   0x4   :  { %786 = vsyncadd [#allocation4], 4294967280 }
   0x5   :  { %19 = sfence }
   0x6   :  { %20 = vsyncpa [#allocation7], 0 }
   0x7   :  { %22 = vsyncpa [#allocation7 + $0x1], 0  ;;  %s881_s28 = smov 0   ;;  %s883_s29 = smov 0  }
   0x8   :  { %s885_s30 = smov 0   ;;  %s887_s8 = smov 0  }
   0x9   :  { %s889_s9 = smov 0   ;;  %s891_s10 = smov 0  }
   0xa   :  { %s893_s0 = smov 0   ;;  %s895_s11 = smov 0  }
   0xb LB: > { %1087 = sst [smem:[#allocation15_spill]] %s803_s30  ;;  %s554_s12 = sadd.s32 4294967295, %s823_s11   ;;  %s823_s11 = sphi %s895_s11, %s28_s11   ;;  %s819_s0 = sphi %s893_s0, %s1106_s0   ;;  %s815_s10 = sphi %s891_s10, %s1105_s10   ;;  %s811_s9 = sphi %s889_s9, %s1104_s9   ;;  %s807_s8 = sphi %s887_s8, %s1103_s8   ;;  %s803_s30 = sphi %s885_s30, %s1102_s30   ;;  %s799_s29 = sphi %s883_s29, %s1108_s29   ;;  %s795_s28 = sphi %s881_s28, %s1107_s28  }
   0xc   : > { %1088 = sst [smem:[#allocation16_spill]] %s815_s10  ;;  %s555_s13 = sadd.s32 4294967294, %s823_s11  }
   0xd   : > { %1089 = sst [smem:[#allocation17_spill]] %s819_s0  ;;  %s37_s14 = sadd.s32 1, %s815_s10 }
   0xe   : > { %p38_p0 = scmp.ge.s32.totalorder %s37_s14, 2  ;;  %s40_s15 = sadd.s32 1, %s819_s0 }
   0xf   : > { %p176_p1 = scmp.ne.s32.totalorder %s803_s30, %s799_s29  ;;  %p177_p2 = scmp.eq.s32.totalorder %s554_s12, 3 }
  0x10   : > { %s1110_s14 = smov (%p38_p0, %s37_s14), 0  ;;  %s1112_s15 = smov (!%p38_p0, %s40_s15), %s819_s0 }
  0x11   : > { %1090 = sst [smem:[#allocation18_spill]] %s1110_s14  ;;  %s162_s16 = ssub.s32 %s815_s10, %s1110_s14 }
  0x12   : > { %p932_p3 = por %p177_p2, %p176_p1  ;;  %p42_p4 = scmp.ge.s32.totalorder %s1112_s15, 2 }
  0x13   : > { %p182_p5 = scmp.ne.s32.totalorder %s799_s29, %s795_s28  ;;  %p183_p6 = scmp.eq.s32.totalorder %s555_s13, 3 }
  0x14   : > { %p558_p7 = scmp.ge.s32.totalorder %s823_s11, 1  ;;  %s1114_s15 = smov (%p42_p4, %s1112_s15), 0 }
  0x15   : > { %1092 = sst [smem:[#allocation19_spill]] %s1114_s15  ;;  %p941_p8 = por %p183_p6, %p182_p5 }
  0x16   : > { %p228_p9 = scmp.lt.s32.totalorder %s823_s11, 5  ;;  %s161_s19 = ssub.s32 %s819_s0, %s1114_s15 }
  0x17   : > { %s1093_s18 = scalar_select %p941_p8, 1, 0 }
  0x18   : > { %s166_s20 = sadd.s32 1, %s803_s30  ;;  %s163_s21 = sor.u32 %s162_s16, %s161_s19 }
  0x19   : > { %1094 = sst [smem:[#allocation20_spill]] %s1093_s18  ;;  %p229_p10 = pnand %p558_p7, %p228_p9 }
  0x1a   : > { %p164_p11 = scmp.eq.s32.totalorder %s163_s21, 0  ;;  %s1082_s23 = sand.u32 (!%p229_p10), 1, %s799_s29  }
  0x1b   : > { %232 = sbr.rel (%p229_p10) target bundleno = 476 (0x1dc), region = 40  ;;  %p263_p12 = scmp.lt.s32.totalorder (!%p229_p10), %s811_s9, 1 }
  0x1c   : > { %s950_s22 = scalar_select %p164_p11, %s803_s30, %s166_s20  }
  0x1d   : > { %s956_s24 = sshll.u32 (!%p229_p10), %s1082_s23, 3  ;;  %p265_p13 = scmp.lt.s32.totalorder (!%p229_p10), %s807_s8, 1 }
  0x1e   : > { %1095 = sst [smem:[#allocation21_spill]] %s950_s22  ;;  %p271_p0 = scmp.lt.s32.totalorder (!%p229_p10), %s807_s8, 3 }
  0x1f   : > { %s563_s12 = sshll.u32 (!%p229_p10), %s811_s9, 4  ;;  %s564_s16 = sshll.u32 (!%p229_p10), %s807_s8, 3 }
  0x20   : > { %s264_s25 = scalar_select %p263_p12, %s811_s9, 1 }
  0x21   : > { %s266_s26 = scalar_select %p265_p13, %s807_s8, 1 }
  0x22   : > { %s560_s27 = sshll.u32 %s264_s25, 1  ;;  %s964_s20 = sadd.s32 %s564_s16, %s563_s12 }
  0x23   : > { %s268_s13 = sadd.s32 %s560_s27, %s266_s26  ;;  %s1096_s1 = sld [smem:[#allocation22_spill]] }
  0x24   : > { %s561_s19 = sshll.u32 %s268_s13, 3  ;;  %s978_s25 = smov 0  }
  0x25   : > { %s272_s0 = scalar_select %p271_p0, %s807_s8, 3 }
  0x27   : > { %s562_s23 = sshll.u32 %s272_s0, 3 }
  0x28   : > { %s975_s30 = scalar_lea.vmem %s1073_s2, %s562_s23 }
  0x29   : > { %s969_s14 = scalar_lea.vmem %s1096_s1, %s561_s19 }
  0x2a LB: >> { %s284_s15 = sadd.s32 %s827_s25, %s964_s20  ;;  %s287_s0 = scalar_lea.vmem [#allocation2], %s827_s25  ;;  %s827_s25 = sphi %s978_s25, %s283_s25  }
  0x2b   : >> { %s285_s26 = sld [smem:[#allocation5 + %s284_s15]]  ;;  %s986_s27 = sshll.u32 %s287_s0, 4  ;;  %s299_s27 = int_to_ptr.vmem [resolvable:$true] %s986_s27 }
  0x2c   : >> { %s288_s13 = scalar_lea.sflag [#allocation3], %s827_s25  ;;  %s697_s15 = scalar_lea.hbm %s1077_s6, 32 }
  0x31   : >> { %s286_s23 = scalar_lea.hbm %s1077_s6, %s285_s26 }
  0x32   : >> { %s296_s12 = sshll.u32 %s286_s23, 4  ;;  %s297_s12 = int_to_ptr.hbm [resolvable:$true] %s296_s12 }
  0x33   : >> { %s693_s16 = sshra.s32 %s297_s12, 4  ;;  %s694_s16 = int_to_ptr.hbm [resolvable:$true] %s693_s16 }
  0x34   : >> { %s695_s19 = scalar_lea.hbm %s694_s16, 1  ;;  %p698_p2 = scmp.lt.s32.totalorder %s694_s16, %s1077_s6 }
  0x35   : >> { %p696_p1 = scmp.ne.s32.totalorder %s694_s16, %s695_s19  ;;  %p699_p4 = scmp.lt.s32.totalorder %s697_s15, %s695_s19 }
  0x37   : >> { %p700_p5 = por %p699_p4, %p698_p2 }
  0x39   : >> { %p701_p6 = pnand %p700_p5, %p696_p1 }
  0x3b   : >> { %704 = shalt.err (!%p701_p6)  }
  0x3c   : >> { %s705_s26 = sshra.s32 %s299_s27, 4  ;;  %s834_s22 = smov [#allocation2]   ;;  %s706_s26 = int_to_ptr.vmem [resolvable:$true] %s705_s26 }
  0x3d   : >> { %s707_s10 = scalar_lea.vmem %s706_s26, 1  ;;  %s709_s23 = scalar_lea.vmem %s834_s22, 8 }
  0x3e   : >> { %p708_p7 = scmp.ne.s32.totalorder %s706_s26, %s707_s10  ;;  %p710_p9 = scmp.lt.s32.totalorder %s706_s26, [#allocation2] }
  0x3f   : >> { %p711_p10 = scmp.lt.s32.totalorder %s709_s23, %s707_s10 }
  0x41   : >> { %p712_p11 = por %p711_p10, %p710_p9 }
  0x43   : >> { %p713_p12 = pnand %p712_p11, %p708_p7 }
  0x45   : >> { %716 = shalt.err (!%p713_p12)  }
  0x46   : >> { %301 = dma.hbm_to_vmem [thread:$0]  %s297_s12, 16, %s299_s27, %s288_s13 }
  0x47   : >> { %s283_s25 = sadd.s32 1, %s827_s25  }
  0x48   : >> { %p280_p13 = scmp.ge.s32.totalorder %s283_s25, 8  }
  0x49   : > { %v303_v0 = vld [vmem:[%s969_s14] sm:$0xff] (%p280_p13)  ;;  %v835_v1 = vmov (%p280_p13), 0   ;;  %v836_v2 = vmov (%p280_p13), 0.0  }
  0x4a   : > { %282 = sbr.rel (!%p280_p13) target bundleno = 42 (0x2a), region = 107  ;;  %669 = vset.pattern.permute.xlu0 (%p280_p13), %v835_v1  ;;  %vm304_vm0 = vcmp.eq.s32.totalorder (%p280_p13), %v303_v0, 0  ;;  %vm315_vm1 = vcmp.eq.s32.totalorder (%p280_p13), %v303_v0, 1  ;;  %v302_v6 = vld [vmem:[%s975_s30] sm:$0xff] (%p280_p13)  ;;  %s829_s30 = smov (%p280_p13), 0  }
  0x4b   : > { %v305_v3 = vsel (%p280_p13), %vm304_vm0, 1.0, %v836_v2  ;;  %v316_v4 = vsel (%p280_p13), %vm315_vm1, 1.0, %v836_v2  ;;  %v1007_v7 = vld [vmem:[%s1075_s4] sm:$0x1] (%p280_p13)  ;;  %v676_v10 = vld [vmem:[%s1074_s3 + $0x1] ss:$0 sm:$0xff] (%p280_p13) }
  0x4c   : > { %v670_v5 = vpack.i.bf16 (%p280_p13), %v316_v4, %v305_v3  ;;  %v1012_v8 = vld [vmem:[%s1076_s5] sm:$0x1] (%p280_p13) }
  0x4d   : > { %v675_v9 = vld [vmem:[%s1074_s3] ss:$0 sm:$0xff] (%p280_p13) }
  0x4e   : > { %671 = vperm.xlu0 (%p280_p13), %669, %v670_v5  }
  0xc0   : > { %v672_v11 = vpop.permute.xlu0 %671 }
  0xc1   : > { %v674_v12 = vunpack.i.h.bf16 %v672_v11  ;;  %v673_v13 = vunpack.i.l.bf16 %v672_v11 }
  0xc3   : > { %v324_v14 = vmul.f32 %v676_v10, %v674_v12  ;;  %v313_v15 = vmul.f32 %v675_v9, %v673_v13 }
  0xc5   : > { %v325_v16 = vadd.f32 %v324_v14, %v313_v15 }
  0xc6 LB: >> { %s334_s16 = scalar_lea.sflag [#allocation3], %s831_s30  ;;  %s831_s30 = sphi %s829_s30, %s333_s30  }
  0xc7   : >> { %787 = dma.done.wait %s334_s16, 16 }
  0xc8   : >> { %788 = vsyncadd %s334_s16, 4294967280  ;;  %s333_s30 = sadd.s32 1, %s831_s30  }
  0xc9   : >> { %p330_p0 = scmp.ge.s32.totalorder %s333_s30, 8  }
  0xca   : > { %v338_v17 = vld [vmem:[#allocation2] sm:$0xff] (%p330_p0)  ;;  %v837_v20 = vmov (%p330_p0), 128.0   ;;  %s566_s19 = sshll.u32 (%p330_p0), %s811_s9, 1  ;;  %v369_v40 = vperm.slane (%p330_p0), %v1007_v7, 0  ;;  %v373_v43 = vperm.slane (%p330_p0), %v1012_v8, 0  ;;  %s1099_s1 = sand.u32 (%p330_p0), 1, %s799_s29  }
  0xcb   : > { %332 = sbr.rel (!%p330_p0) target bundleno = 198 (0xc6), region = 118  ;;  %v339_v18 = vadd.f32 (%p330_p0), %v338_v17, %v325_v16  ;;  %677 = vrcp.f32 (%p330_p0), %v837_v20  ;;  %s388_s21 = sadd.s32 (%p330_p0), %s807_s8, %s566_s19 }
  0xcc   : > { %s567_s15 = sshll.u32 (%p330_p0), %s388_s21, 3  ;;  %s1097_s8 = scalar_lea.vmem (%p330_p0), [#allocation6], %s956_s24 }
  0xcd   : > { %v340_v19 = vadd.f32 (%p330_p0), %v339_v18, %v302_v6  ;;  %s390_s10 = scalar_lea.hbm (%p330_p0), %s1078_s7, %s567_s15  ;;  %s392_s9 = sshll.u32 (%p330_p0), %s1097_s8, 4  ;;  %s393_s9 = int_to_ptr.vmem [resolvable:$true] %s392_s9 }
  0xce   : > { %s394_s22 = sshll.u32 (%p330_p0), %s390_s10, 4  ;;  %s1098_s23 = smov (%p330_p0), %s1097_s8  ;;  %s395_s22 = int_to_ptr.hbm [resolvable:$true] %s394_s22 }
  0xcf   : > { %341 = vadd.xlane.f32.xlu0 (%p330_p0), %v340_v19  ;;  %s378_s18 = scalar_lea.sflag (%p330_p0), [#allocation7], %s1099_s1  ;;  %s731_s25 = sshra.s32 (%p330_p0), %s395_s22, 4  ;;  %s732_s25 = int_to_ptr.hbm [resolvable:$true] %s731_s25 }
  0xd0   : > { %s733_s27 = scalar_lea.hbm %s732_s25, 8  ;;  %s737_s12 = scalar_lea.hbm %s1078_s7, 32 }
  0xd1   : > { %v678_v21 = vpop.eup %677  ;;  %p734_p1 = scmp.ne.s32.totalorder %s732_s25, %s733_s27  ;;  %p738_p5 = scmp.lt.s32.totalorder %s732_s25, %s1078_s7 }
  0xd2   : > { %v344_v22 = vmul.f32 128.0, %v678_v21  ;;  %vm348_vm2 = vweird.f32 %v678_v21  ;;  %p739_p6 = scmp.lt.s32.totalorder %s737_s12, %s733_s27 }
  0xd3   : > { %p735_p2 = pnand %p734_p1, %p932_p3 }
  0xd4   : > { %v345_v23 = vsub.f32 1.0, %v344_v22  ;;  %p740_p7 = por %p739_p6, %p738_p5 }
  0xd5   : > { %p736_p4 = pneg %p735_p2 }
  0xd6   : > { %v346_v24 = vmul.f32 %v678_v21, %v345_v23 }
  0xd7   : > { %p741_p9 = pnand %p740_p7, %p736_p4 }
  0xd8   : > { %v347_v25 = vadd.f32 %v678_v21, %v346_v24 }
  0xda   : > { %v349_v26 = vsel %vm348_vm2, %v678_v21, %v347_v25 }
 0x142   : > { %v342_v27 = vpop.xlane.xlu0 %341 }
 0x143   : > { %v350_v28 = vmul.f32 %v349_v26, %v342_v27 }
 0x145   : > { %v351_v29 = vsub.f32 %v340_v19, %v350_v28 }
 0x147   : > { %v352_v30 = vmul.f32 %v351_v29, %v351_v29 }
 0x149   : > { %353 = vadd.xlane.f32.xlu0 %v352_v30 }
 0x1bc   : > { %v354_v31 = vpop.xlane.xlu0 %353 }
 0x1bd   : > { %v355_v32 = vmul.f32 %v354_v31, %v349_v26 }
 0x1bf   : > { %v356_v33 = vadd.f32 1e-12, %v355_v32 }
 0x1c1   : > { %679 = vrsqrt.f32 %v356_v33  ;;  %vm363_vm4 = vweird.f32 %v356_v33 }
 0x1c7   : > { %v680_v34 = vpop.eup %679 }
 0x1c8   : > { %v358_v35 = vmul.f32 %v680_v34, %v356_v33  ;;  %vm364_vm3 = vweird.f32 %v680_v34 }
 0x1c9   : > { %vm365_vm5 = vmor %vm363_vm4, %vm364_vm3 }
 0x1ca   : > { %v359_v36 = vmul.f32 %v680_v34, %v358_v35 }
 0x1cc   : > { %v360_v37 = vmul.f32 0.5, %v359_v36 }
 0x1ce   : > { %v361_v38 = vsub.f32 1.5, %v360_v37 }
 0x1d0   : > { %v362_v39 = vmul.f32 %v680_v34, %v361_v38 }
 0x1d2   : > { %v366_v41 = vsel %vm365_vm5, %v680_v34, %v362_v39 }
 0x1d3   : > { %v367_v42 = vmul.f32 %v366_v41, %v351_v29 }
 0x1d5   : > { %v371_v44 = vmul.f32 %v369_v40, %v367_v42 }
 0x1d7   : > { %v375_v45 = vadd.f32 %v373_v43, %v371_v44 }
 0x1d9   : > { %376 = vst [vmem:[%s1098_s23] sm:$0xff] %v375_v45 }
 0x1da   : > { %744 = shalt.err (!%p741_p9)
}
 0x1db   : > { %578 = dma.vmem_to_hbm [thread:$0]  (%p932_p3), %s393_s9, 128, %s395_s22, %s378_s18  }
 0x1dc PF: > { %p584_p10 = scmp.ge.s32.totalorder %s823_s11, 2  ;;  %s406_s16 = sand.u32 1, %s795_s28  }
 0x1dd   : > { %s407_s19 = scalar_lea.sflag [#allocation7], %s406_s16 }
 0x1de   : > { %p581_p11 = pnand %p584_p10, %p941_p8 }
 0x1e0   : > { %p582_p12 = pneg %p581_p11 }
 0x1e2   : > { %790 = dma.done.wait (%p582_p12), %s407_s19, 128  }
 0x1e3   : > { %792 = vsyncadd (%p582_p12), %s407_s19, 4294967168  ;;  %s28_s11 = sadd.s32 1, %s823_s11   ;;  %s1101_s21 = sld [smem:[#allocation15_spill]] }
 0x1e4   : > { %p25_p13 = scmp.ge.s32.totalorder %s28_s11, 6   ;;  %s1102_s30 = sld [smem:[#allocation21_spill]] }
 0x1e5   : > { %s1103_s8 = sld [smem:[#allocation16_spill]]  ;;  %s1107_s28 = smov %s799_s29 }
 0x1e6   : > { %s1104_s9 = sld [smem:[#allocation17_spill]]  ;;  %27 = sbr.rel (!%p25_p13) target bundleno = 11 (0xb), region = 129 }
 0x1e7   : > { %s1105_s10 = sld [smem:[#allocation18_spill]] }
 0x1e8   : > { %s1106_s0 = sld [smem:[#allocation19_spill]] }
 0x1e9   : > { %s1108_s29 = smov %s1101_s21 }
 0x1eb   :  { %413 = vsyncpa [#allocation7], 1 }
 0x1ec   :  { %415 = vsyncpa [#allocation7 + $0x1], 1 }
 0x1ed   :  { %416 = vsyncmov [#allocation3] }
 0x1f0   :  { %s417_s17 = vpop.sfrf %416 }
 0x1f1   :  { %p570_p3 = scmp.ne.s32.totalorder %s417_s17, 0 }
 0x1f3   :  { %421 = shalt.err (%p570_p3)  }
 0x1f4   :  { %423 = vsyncmov [#allocation3 + $0x1] }
 0x1f7   :  { %s424_s15 = vpop.sfrf %423 }
 0x1f8   :  { %p571_p8 = scmp.ne.s32.totalorder %s424_s15, 0 }
 0x1fa   :  { %428 = shalt.err (%p571_p8)  }
 0x1fb   :  { %430 = vsyncmov [#allocation3 + $0x2] }
 0x1fe   :  { %s431_s26 = vpop.sfrf %430 }
 0x1ff   :  { %p572_p0 = scmp.ne.s32.totalorder %s431_s26, 0 }
 0x201   :  { %435 = shalt.err (%p572_p0)  }
 0x202   :  { %437 = vsyncmov [#allocation3 + $0x3] }
 0x205   :  { %s438_s22 = vpop.sfrf %437 }
 0x206   :  { %p573_p1 = scmp.ne.s32.totalorder %s438_s22, 0 }
 0x208   :  { %442 = shalt.err (%p573_p1)  }
 0x209   :  { %444 = vsyncmov [#allocation3 + $0x4] }
 0x20c   :  { %s445_s11 = vpop.sfrf %444 }
 0x20d   :  { %p574_p2 = scmp.ne.s32.totalorder %s445_s11, 0 }
 0x20f   :  { %449 = shalt.err (%p574_p2)  }
 0x210   :  { %451 = vsyncmov [#allocation3 + $0x5] }
 0x213   :  { %s452_s2 = vpop.sfrf %451 }
 0x214   :  { %p575_p4 = scmp.ne.s32.totalorder %s452_s2, 0 }
 0x216   :  { %456 = shalt.err (%p575_p4)  }
 0x217   :  { %458 = vsyncmov [#allocation3 + $0x6] }
 0x21a   :  { %s459_s3 = vpop.sfrf %458 }
 0x21b   :  { %p576_p5 = scmp.ne.s32.totalorder %s459_s3, 0 }
 0x21d   :  { %463 = shalt.err (%p576_p5)  }
 0x21e   :  { %465 = vsyncmov [#allocation3 + $0x7] }
 0x221   :  { %s466_s4 = vpop.sfrf %465 }
 0x222   :  { %p577_p6 = scmp.ne.s32.totalorder %s466_s4, 0 }
 0x224   :  { %470 = shalt.err (%p577_p6)  }

</bundles_post_ra>
